<compile_context>
chip_gen: v7x
topology: tpu7x:2x2x1
jax: 0.10.0
libtpu: 0.0.40
codegen_flags: <defaults>
</compile_context>

<pallas_src>
import jax
import jax.numpy as jnp
from jax.experimental import pallas as pl
from jax.experimental.pallas import tpu as pltpu


def _make_conv3x3_kernel(W, M_span, n_tail, compute_dtype, precision):
    """Builds the per-image kernel body.  All sizes are Python constants."""

    def kernel(x_ref, w_ref, b_ref, o_ref):
        # x_ref: (1, Cin, H*W)   one NCHW image, spatial dims flattened
        # w_ref: (Cout, 9*Cin)   folded 3x3 weights, K ordered (kh, kw, cin)
        # b_ref: (Cout, 1)
        # o_ref: (1, Cout, Ho*W) NCHW output rows, still W wide (2 junk cols/row)
        x = x_ref[0].astype(compute_dtype)                 # (Cin, H*W)
        w = w_ref[...].astype(compute_dtype)               # (Cout, 9*Cin)

        # In-VMEM im2col: 9 statically shifted lane-slices of the flattened
        # image, stacked along the contraction (sublane) axis.
        taps = [x[:, kh * W + kw: kh * W + kw + M_span]
                for kh in range(3) for kw in range(3)]     # 9 x (Cin, M_span)
        patches = jnp.concatenate(taps, axis=0)            # (9*Cin, M_span)

        # Transposed GEMM -> (Cout, M_span): spatial on the lane axis
        # (lane-dense output) and already NCHW-ordered.  f32 accumulation.
        acc = jnp.dot(w, patches, precision=precision,
                      preferred_element_type=jnp.float32)
        acc = acc + b_ref[...]                             # fused bias

        if n_tail:                                         # fill the 2 tail
            acc = jnp.concatenate(                         # cols so the store
                [acc, jnp.zeros((acc.shape[0], n_tail), acc.dtype)], axis=-1)
        o_ref[0] = acc.astype(o_ref.dtype)

    return kernel


def conv_block_forward(x_nchw, weight, bias, *, compute_dtype=jnp.bfloat16,
                       precision=None):
    """Conv_block.forward: 3x3 conv, stride 1, no padding, with bias.

    Args:
      x_nchw: (B, Cin, H, W) float32  -- PyTorch NCHW layout.
      weight: (Cout, Cin, 3, 3) float32 -- PyTorch conv weight layout.
      bias:   (Cout,) float32.
      compute_dtype: MXU operand dtype (bf16 default; f32 for exactness).
      precision: dot precision; defaults to HIGHEST for f32 operands.
    Returns:
      (B, Cout, H-2, W-2) in x's dtype, NCHW layout.
    """
    B, Cin, H, W = x_nchw.shape
    Cout = weight.shape[0]
    assert H >= 3 and W >= 3, "3x3 VALID conv needs H, W >= 3"

    compute_dtype = jnp.dtype(compute_dtype)
    if precision is None:
        precision = (jax.lax.Precision.HIGHEST
                     if compute_dtype == jnp.float32
                     else jax.lax.Precision.DEFAULT)

    Ho, Wo = H - 2, W - 2
    HW = H * W
    K = 9 * Cin
    M_out = Ho * W          # per-image GEMM columns (incl. 2 junk cols / row)
    M_span = Ho * W - 2     # columns actually computed (keeps taps in-bounds)
    n_tail = M_out - M_span

    # --- free / tiny layout plumbing (no HBM passes over activations) -------
    x_flat = x_nchw.reshape(B, Cin, HW)                    # contiguous reshape
    # (Cout, Cin, 3, 3) -> (Cout, kh, kw, cin) -> (Cout, 9*Cin): matches the
    # (kh, kw, cin) ordering of the in-kernel patch rows.
    w_mat = jnp.transpose(weight, (0, 2, 3, 1)).reshape(Cout, K)
    b_col = bias.reshape(Cout, 1)

    # --- VMEM budget (double-buffered blocks + in-kernel patch temporaries) -
    itemsize = jnp.dtype(x_nchw.dtype).itemsize
    cbytes = compute_dtype.itemsize
    x_blk = Cin * HW * itemsize
    o_blk = Cout * M_out * itemsize
    w_blk = (Cout * K + Cout) * w_mat.dtype.itemsize
    scratch = 2 * K * M_span * cbytes + 2 * Cout * M_span * 4
    est = 2 * (x_blk + o_blk) + 2 * w_blk + scratch + (4 << 20)
    vmem_limit = int(min(max(est, 32 << 20), 48 << 20))    # v7x-safe cap

    cost = pl.CostEstimate(
        flops=2 * B * Cout * K * M_span,
        transcendentals=0,
        bytes_accessed=B * (x_blk + o_blk) + w_blk)

    kernel = _make_conv3x3_kernel(W, M_span, n_tail, compute_dtype, precision)

    out_flat = pl.pallas_call(
        kernel,
        out_shape=jax.ShapeDtypeStruct((B, Cout, M_out), x_nchw.dtype),
        grid_spec=pltpu.PrefetchScalarGridSpec(
            num_scalar_prefetch=0,
            grid=(B,),
            in_specs=[
                pl.BlockSpec((1, Cin, HW), lambda b: (b, 0, 0)),
                pl.BlockSpec((Cout, K), lambda b: (0, 0)),
                pl.BlockSpec((Cout, 1), lambda b: (0, 0)),
            ],
            out_specs=pl.BlockSpec((1, Cout, M_out), lambda b: (b, 0, 0)),
        ),
        compiler_params=pltpu.CompilerParams(
            dimension_semantics=("parallel",),
            vmem_limit_bytes=vmem_limit,
        ),
        cost_estimate=cost,
    )(x_flat, w_mat, b_col)

    # (B, Cout, Ho*W) -> (B, Cout, Ho, W) -> drop the 2 junk columns per row.
    out = out_flat.reshape(B, Cout, Ho, W)[:, :, :, :Wo]
    return out


def _reference_conv(x_nchw, weight, bias):
    out = jax.lax.conv_general_dilated(
        x_nchw, weight, window_strides=(1, 1), padding="VALID",
        dimension_numbers=("NCHW", "OIHW", "NCHW"),
        precision=jax.lax.Precision.HIGHEST)
    return out + bias.reshape(1, -1, 1, 1)


if __name__ == "__main__":
    key = jax.random.PRNGKey(0)
    k_x, k_w, k_b = jax.random.split(key, 3)

    B, Cin, H, W = 2, 4, 16, 16
    Cout = 8

    x = jax.random.normal(k_x, (B, Cin, H, W), dtype=jnp.float32)
    # Deterministic init mimicking PyTorch's default uniform bound 1/sqrt(fan_in).
    fan_in = Cin * 3 * 3
    bound = 1.0 / (fan_in ** 0.5)
    weight = jax.random.uniform(k_w, (Cout, Cin, 3, 3), jnp.float32,
                                minval=-bound, maxval=bound)
    bias = jax.random.uniform(k_b, (Cout,), jnp.float32,
                              minval=-bound, maxval=bound)

    ref = _reference_conv(x, weight, bias)

    # Exact path: f32 operands, pinned HIGHEST precision, 1e-4 tolerance.
    out_f32 = jax.block_until_ready(
        conv_block_forward(x, weight, bias, compute_dtype=jnp.float32))
    assert out_f32.shape == (B, Cout, H - 2, W - 2)
    assert jnp.allclose(out_f32, ref, atol=1e-4, rtol=1e-4)

    # Fast path (default): bf16 operands on the MXU with f32 accumulation.
    out_bf16 = jax.block_until_ready(conv_block_forward(x, weight, bias))
    assert out_bf16.shape == (B, Cout, H - 2, W - 2)
    assert jnp.allclose(out_bf16, ref, atol=3e-2, rtol=3e-2)

    print("KERNEL_OK")
</pallas_src>

<mosaic_0001>
module attributes {stable_mosaic.version = 11 : i64} {
  func.func @kernel(%arg0: i32, %arg1: memref<1x4x256xf32, #tpu.memory_space<vmem>>, %arg2: memref<8x36xf32, #tpu.memory_space<vmem>>, %arg3: memref<8x1xf32, #tpu.memory_space<vmem>>, %arg4: memref<1x8x224xf32, #tpu.memory_space<vmem>>) attributes {dimension_semantics = [#tpu.dimension_semantics<parallel>], iteration_bounds = array<i64: 2>, scalar_prefetch = 0 : i64, scratch_operands = 0 : i64, tpu.core_type = #tpu.core_type<tc>, window_params = [{transform_indices = @transform_0, window_bounds = array<i64: 1, 4, 256>}, {pipeline_mode = #tpu.pipeline_mode<synchronous>, transform_indices = @transform_1, window_bounds = array<i64: 8, 36>}, {pipeline_mode = #tpu.pipeline_mode<synchronous>, transform_indices = @transform_2, window_bounds = array<i64: 8, 1>}, {transform_indices = @transform_3, window_bounds = array<i64: 1, 8, 224>}]} {
    %c0 = arith.constant 0 : index
    %c0_0 = arith.constant 0 : index
    %c0_1 = arith.constant 0 : index
    %0 = vector.load %arg1[%c0, %c0_0, %c0_1] : memref<1x4x256xf32, #tpu.memory_space<vmem>>, vector<1x4x256xf32>
    %1 = vector.shape_cast %0 : vector<1x4x256xf32> to vector<4x256xf32>
    %c0_2 = arith.constant 0 : index
    %c0_3 = arith.constant 0 : index
    %2 = vector.load %arg2[%c0_2, %c0_3] : memref<8x36xf32, #tpu.memory_space<vmem>>, vector<8x36xf32>
    %3 = vector.extract_strided_slice %1 {offsets = [0, 0], sizes = [4, 222], strides = [1, 1]} : vector<4x256xf32> to vector<4x222xf32>
    %4 = vector.extract_strided_slice %1 {offsets = [0, 1], sizes = [4, 222], strides = [1, 1]} : vector<4x256xf32> to vector<4x222xf32>
    %5 = vector.extract_strided_slice %1 {offsets = [0, 2], sizes = [4, 222], strides = [1, 1]} : vector<4x256xf32> to vector<4x222xf32>
    %6 = vector.extract_strided_slice %1 {offsets = [0, 16], sizes = [4, 222], strides = [1, 1]} : vector<4x256xf32> to vector<4x222xf32>
    %7 = vector.extract_strided_slice %1 {offsets = [0, 17], sizes = [4, 222], strides = [1, 1]} : vector<4x256xf32> to vector<4x222xf32>
    %8 = vector.extract_strided_slice %1 {offsets = [0, 18], sizes = [4, 222], strides = [1, 1]} : vector<4x256xf32> to vector<4x222xf32>
    %9 = vector.extract_strided_slice %1 {offsets = [0, 32], sizes = [4, 222], strides = [1, 1]} : vector<4x256xf32> to vector<4x222xf32>
    %10 = vector.extract_strided_slice %1 {offsets = [0, 33], sizes = [4, 222], strides = [1, 1]} : vector<4x256xf32> to vector<4x222xf32>
    %11 = vector.extract_strided_slice %1 {offsets = [0, 34], sizes = [4, 222], strides = [1, 1]} : vector<4x256xf32> to vector<4x222xf32>
    %12 = tpu.concatenate %3, %4, %5, %6, %7, %8, %9, %10, %11 in 0 : vector<4x222xf32>, vector<4x222xf32>, vector<4x222xf32>, vector<4x222xf32>, vector<4x222xf32>, vector<4x222xf32>, vector<4x222xf32>, vector<4x222xf32>, vector<4x222xf32> -> vector<36x222xf32>
    %cst = arith.constant dense<0.000000e+00> : vector<8x222xf32>
    %13 = tpu.matmul %2, %12, %cst {dimension_numbers = #tpu.dot_dimension_numbers<[1], [0], [0], [1], [0, 0, 1, 1], [], []>, precision = #tpu.contract_precision<fp32>} : vector<8x36xf32>, vector<36x222xf32>, vector<8x222xf32> -> vector<8x222xf32>
    %c0_4 = arith.constant 0 : index
    %c0_5 = arith.constant 0 : index
    %14 = vector.load %arg3[%c0_4, %c0_5] : memref<8x1xf32, #tpu.memory_space<vmem>>, vector<8x1xf32>
    %15 = vector.broadcast %14 : vector<8x1xf32> to vector<8x222xf32>
    %16 = arith.addf %13, %15 : vector<8x222xf32>
    %cst_6 = arith.constant 0.000000e+00 : f32
    %17 = vector.broadcast %cst_6 : f32 to vector<8x2xf32>
    %18 = tpu.concatenate %16, %17 in 1 : vector<8x222xf32>, vector<8x2xf32> -> vector<8x224xf32>
    %c0_7 = arith.constant 0 : index
    %c0_8 = arith.constant 0 : index
    %c0_9 = arith.constant 0 : index
    %19 = vector.load %arg4[%c0_7, %c0_8, %c0_9] : memref<1x8x224xf32, #tpu.memory_space<vmem>>, vector<1x8x224xf32>
    %20 = vector.shape_cast %19 : vector<1x8x224xf32> to vector<8x224xf32>
    %21 = vector.shape_cast %18 : vector<8x224xf32> to vector<1x8x224xf32>
    tpu.vector_store %arg4[%c0_7, %c0_8, %c0_9], %21 {strides = array<i32>} : memref<1x8x224xf32, #tpu.memory_space<vmem>>, vector<1x8x224xf32>,
    return
  }
  func.func @transform_0(%arg0: i32) -> (i32, i32, i32) {
    %c0_i32 = arith.constant 0 : i32
    %c0_i32_0 = arith.constant 0 : i32
    %c0_i32_1 = arith.constant 0 : i32
    return %arg0, %c0_i32, %c0_i32_0 : i32, i32, i32
  }
  func.func @transform_1(%arg0: i32) -> (i32, i32) {
    %c0_i32 = arith.constant 0 : i32
    %c0_i32_0 = arith.constant 0 : i32
    %c0_i32_1 = arith.constant 0 : i32
    return %c0_i32, %c0_i32_0 : i32, i32
  }
  func.func @transform_2(%arg0: i32) -> (i32, i32) {
    %c0_i32 = arith.constant 0 : i32
    %c0_i32_0 = arith.constant 0 : i32
    %c0_i32_1 = arith.constant 0 : i32
    return %c0_i32, %c0_i32_0 : i32, i32
  }
  func.func @transform_3(%arg0: i32) -> (i32, i32, i32) {
    %c0_i32 = arith.constant 0 : i32
    %c0_i32_0 = arith.constant 0 : i32
    %c0_i32_1 = arith.constant 0 : i32
    return %arg0, %c0_i32, %c0_i32_0 : i32, i32, i32
  }
}

</mosaic_0001>

<bundles_post_ra>
// kernel: tpu_custom_call.1
= control target key start
LH: loop header
LB: loop body
LE: loop exit
PB: predicated region body
PF: predicated region fallthrough
CT: control target
= control target key end

     0   :  { %8 = vsyncpa [#allocation3], 0  ;;  %s1475_s0 = inlined_call_operand.hbm [shape: f32[2,4,256], index: 0, kind: input, shape index: {}]   ;;  %s1476_s1 = inlined_call_operand.vmem [shape: f32[8,36], index: 1, kind: input, shape index: {}]   ;;  %s1477_s2 = inlined_call_operand.vmem [shape: f32[8,1], index: 2, kind: input, shape index: {}]   ;;  %s1478_s3 = inlined_call_operand.hbm [shape: f32[2,8,224], index: 3, kind: output, shape index: {}]  }
   0x1   :  { %10 = vsyncpa [#allocation3 + $0x1], 0 }
   0x2   :  { %11 = vsyncpa [#allocation4], 0 }
   0x3   :  { %13 = vsyncpa [#allocation4 + $0x1], 0  ;;  %s1200_s12 = smov 0   ;;  %s1202_s13 = smov 0  }
   0x4   :  { %s1204_s14 = smov 0   ;;  %s1206_s15 = smov 0  }
   0x5 LB: > { %s1221_s16 = sadd.s32 4294967295, %s1166_s15   ;;  %s935_s17 = sadd.s32 4294967294, %s1166_s15   ;;  %s1166_s15 = sphi %s1206_s15, %s1493_s15   ;;  %s1162_s14 = sphi %s1204_s14, %s1492_s14   ;;  %s1158_s13 = sphi %s1202_s13, %s1491_s13   ;;  %s1154_s12 = sphi %s1200_s12, %s1490_s12  }
   0x6   : > { %s1225_s18 = sadd.s32 1, %s1166_s15   ;;  %s26_s19 = sadd.s32 1, %s1162_s14 }
   0x7   : > { %s23_s20 = ssub.s32 %s1166_s15, %s1225_s18  ;;  %p33_p0 = scmp.ne.s32.totalorder %s1162_s14, %s1158_s13 }
   0x8   : > { %p24_p1 = scmp.eq.s32.totalorder %s23_s20, 0  ;;  %p34_p2 = scmp.eq.s32.totalorder %s1166_s15, 0 }
   0x9   : > { %p39_p3 = scmp.ne.s32.totalorder %s1158_s13, %s1154_s12  ;;  %p40_p4 = scmp.eq.s32.totalorder %s1221_s16, 0 }
   0xa   : > { %s1237_s21 = scalar_select %p24_p1, %s1162_s14, %s26_s19  }
   0xb   : > { %p1239_p5 = por %p34_p2, %p33_p0  ;;  %p1243_p6 = por %p40_p4, %p39_p3 }
   0xc   : > { %p105_p7 = scmp.eq.s32.totalorder %s1221_s16, 1  ;;  %p111_p8 = scmp.eq.s32.totalorder %s935_s17, 1 }
   0xd   : > { %p1023_p10 = scmp.lt.s32.totalorder %s1166_s15, 2  ;;  %s137_s26 = sand.u32 1, %s1162_s14  }
   0xe   : > { %p1250_p11 = por %p105_p7, %p33_p0  ;;  %p1254_p12 = por %p111_p8, %p39_p3 }
   0xf   : > { %s949_s27 = sshll.u32 %s1166_s15, 7  ;;  %s938_s28 = sshll.u32 %s137_s26, 3 }
  0x10   : > { %s1482_s24 = scalar_select %p1250_p11, 1, 0 }
  0x11   : > { %s1483_s25 = scalar_select %p1254_p12, 1, 0 }
  0x12   : > { %s1263_s4 = scalar_lea.hbm %s1475_s0, %s949_s27  ;;  %s141_s5 = scalar_lea.vmem [#allocation2], %s938_s28 }
  0x13   : > { %s149_s6 = sshll.u32 %s141_s5, 4  ;;  %p1267_p13 = pnand %p1023_p10, %p1239_p5  ;;  %s1271_s6 = int_to_ptr.vmem [resolvable:$true] %s149_s6 }
  0x14   : > { %s138_s8 = scalar_lea.sflag [#allocation3], %s137_s26  ;;  %s1070_s9 = scalar_lea.hbm %s1263_s4, 128 }
  0x15   : > { %p1071_p2 = scmp.ne.s32.totalorder %s1263_s4, %s1070_s9  ;;  %p1072_p3 = pneg %p1267_p13 }
  0x16   : > { %s1075_s17 = scalar_lea.hbm %s1475_s0, 256  ;;  %p1076_p5 = scmp.lt.u32.totalorder %s1263_s4, %s1475_s0 }
  0x17   : > { %p1073_p4 = pnand %p1072_p3, %p1071_p2  ;;  %p1077_p8 = scmp.lt.u32.totalorder %s1075_s17, %s1070_s9 }
  0x18   : > { %p1079_p9 = scmp.lt.u32.totalorder %s1070_s9, %s1263_s4 }
  0x19   : > { %p1074_p7 = pneg %p1073_p4  ;;  %p1078_p10 = por %p1077_p8, %p1076_p5 }
  0x1b   : > { %p1080_p0 = por %p1079_p9, %p1078_p10 }
  0x1d   : > { %p1081_p1 = pnand %p1080_p0, %p1074_p7 }
  0x1f   : > { %1084 = shalt.err (!%p1081_p1)
}
  0x20   : > { %s1085_s22 = scalar_lea.vmem %s1271_s6, 128  ;;  %s1168_s26 = smov [#allocation2]  }
  0x21   : > { %p1086_p2 = scmp.ne.s32.totalorder %s1271_s6, %s1085_s22  ;;  %s1090_s27 = sshll.u32 %s1168_s26, 4  ;;  %s1091_s27 = int_to_ptr.vmem [resolvable:$false] %s1090_s27 }
  0x22   : > { %s1092_s28 = scalar_lea.vmem %s1091_s27, 256  ;;  %p1093_p11 = scmp.lt.s32.totalorder %s1271_s6, %s1091_s27 }
  0x23   : > { %p1088_p4 = pnand %p1086_p2, %p1072_p3  ;;  %p1094_p5 = scmp.lt.s32.totalorder %s1092_s28, %s1085_s22 }
  0x25   : > { %p1089_p12 = pneg %p1088_p4  ;;  %p1095_p8 = por %p1094_p5, %p1093_p11 }
  0x27   : > { %p1096_p9 = pnand %p1095_p8, %p1089_p12 }
  0x29   : > { %1099 = shalt.err (!%p1096_p9)
}
  0x2a   : > { %1018 = dma.hbm_to_vmem [thread:$0]  (!%p1267_p13), %s1263_s4, 128, %s1271_s6, %s138_s8  }
  0x2b   : > { %p1485_p0 = scmp.lt.s32.totalorder %s1166_s15, 3  ;;  %p1486_p1 = scmp.ge.s32.totalorder %s1166_s15, 1 }
  0x2d   : > { %p155_p3 = pnand %p1486_p1, %p1485_p0 }
  0x2e   : > { %s1305_s29 = sand.u32 (!%p155_p3), 1, %s1158_s13  }
  0x2f   : > { %158 = sbr.rel (%p155_p3) target bundleno = 460 (0x1cc), region = 32  ;;  %s942_s30 = sshll.u32 (!%p155_p3), %s1305_s29, 3 }
  0x30   : > { %s161_s5 = scalar_lea.sflag (!%p155_p3), [#allocation3], %s1305_s29  ;;  %s164_s9 = scalar_lea.vmem (!%p155_p3), [#allocation2], %s942_s30 }
  0x36   : > { %1145 = dma.done.wait (%p1243_p6), %s161_s5, 128  }
  0x37   : > { %1147 = vsyncadd (%p1243_p6), %s161_s5, 4294967168  ;;  %v187_v0 = vld [vmem:[%s164_s9] sm:$0xff]  ;;  %s1169_s4 = smov 126   ;;  %s1170_s6 = smov 127   ;;  %v1175_v3 = vmov 0.0   ;;  %v1178_v5 = vmov 0  }
  0x38   : > { %201 = vrot.lane.b32.xlu1 %v187_v0, %s1169_s4  ;;  %195 = vrot.lane.b32.xlu0 %v187_v0, %s1170_s6  ;;  %v192_v1 = vcombine.low %v187_v0, %v187_v0  ;;  %s1171_s7 = smov 112   ;;  %v190_v2 = vcombine.high %v187_v0, %v187_v0  ;;  %s1172_s8 = smov 111   ;;  %v264_v4 = vld [vmem:[%s1477_s2] sm:$0xff]  ;;  %vm197_vm0 = vcmask 1039360   ;;  %vm255_vm1 = vcmask 1043456  }
  0x39   : > { %s1173_s10 = smov 110   ;;  %s1174_s23 = smov 96   ;;  %352 = vmatprep.mubr.f32.mxu1 %v1175_v3  ;;  %653 = vmatprep.mubr.f32.mxu0 %v1175_v3  ;;  %vm213_vm2 = vcmask 916480   ;;  %vm205_vm3 = vcmask 1031168   ;;  %v188_v15 = vld [vmem:[%s1476_s1] sm:$0xff]  ;;  %vm270_vm4 = vcmask 293888  }
  0x3a   : > { %s1176_s11 = smov 95   ;;  %s1177_s17 = smov 94   ;;  %1067 = vset.pattern.permute.xlu0 %v1178_v5  ;;  %v272_v24 = vsel %vm270_vm4, %v188_v15, 0  ;;  %vm221_vm5 = vcmask 908288   ;;  %vm229_vm6 = vcmask 900096   ;;  %vm237_vm7 = vcmask 785408  }
  0x3b   : > { %v1331_v29 = vand.u32 4294901760, %v272_v24  ;;  %vm245_vm8 = vcmask 777216   ;;  %vm253_vm9 = vcmask 769024   ;;  %s943_s27 = sshll.u32 %s1305_s29, 4  ;;  %s950_s28 = sshll.u32 %s1221_s16, 8 }
  0x3c   : > { %211 = vrot.lane.b32.xlu1 %v187_v0, %s1171_s7  ;;  %193 = vrot.lane.b32.xlu0 %v192_v1, %s1170_s6  ;;  %s186_s30 = scalar_lea.vmem [#allocation5], %s943_s27  ;;  %s1429_s6 = scalar_lea.hbm %s1478_s3, %s950_s28 }
  0x3d   : > { %v1340_v38 = vsub.f32 %v272_v24, %v1331_v29  ;;  %s865_s5 = sshll.u32 %s186_s30, 4  ;;  %s851_s16 = scalar_lea.sflag [#allocation4], %s1305_s29  ;;  %s1431_s5 = int_to_ptr.vmem [resolvable:$true] %s865_s5 }
  0x3e   : > { %p1487_p11 = scmp.ne.s32.totalorder %s1482_s24, 0 }
  0x3f   : > { %v355_v47 = vand.u32 4294901760, %v1340_v38 }
  0x40   : > { %209 = vrot.lane.b32.xlu0 %v192_v1, %s1171_s7  ;;  %203 = vrot.lane.b32.xlu1 %v190_v2, %s1169_s4  ;;  %s1100_s7 = scalar_lea.vmem %s1431_s5, 256 }
  0x41   : > { %v356_v61 = vsub.f32 %v1340_v38, %v355_v47  ;;  %p1101_p6 = scmp.ne.s32.totalorder %s1431_s5, %s1100_s7 }
  0x43   : > { %p1102_p12 = pnand %p1101_p6, %p1487_p11 }
  0x44   : > { %217 = vrot.lane.b32.xlu0 %v187_v0, %s1172_s8  ;;  %219 = vrot.lane.b32.xlu1 %v190_v2, %s1172_s8  ;;  %s1179_s8 = smov [#allocation5]  }
  0x45   : > { %p1103_p13 = pneg %p1102_p12 }
  0x48   : > { %225 = vrot.lane.b32.xlu0 %v192_v1, %s1173_s10  ;;  %227 = vrot.lane.b32.xlu1 %v187_v0, %s1173_s10  ;;  %s1104_s10 = sshll.u32 %s1179_s8, 4  ;;  %s1105_s10 = int_to_ptr.vmem [resolvable:$false] %s1104_s10 }
  0x49   : > { %p1107_p7 = scmp.lt.s32.totalorder %s1431_s5, %s1105_s10 }
  0x4c   : > { %233 = vrot.lane.b32.xlu0 %v187_v0, %s1174_s23  ;;  %235 = vrot.lane.b32.xlu1 %v190_v2, %s1174_s23  ;;  %s1106_s23 = scalar_lea.vmem %s1105_s10, 512 }
  0x4d   : > { %p1108_p10 = scmp.lt.s32.totalorder %s1106_s23, %s1100_s7 }
  0x4f   : > { %p1109_p2 = por %p1108_p10, %p1107_p7 }
  0x50   : > { %241 = vrot.lane.b32.xlu0 %v192_v1, %s1176_s11  ;;  %243 = vrot.lane.b32.xlu1 %v187_v0, %s1176_s11 }
  0x51   : > { %p1110_p4 = pnand %p1109_p2, %p1103_p13 }
  0x54   : > { %249 = vrot.lane.b32.xlu0 %v187_v0, %s1177_s17  ;;  %251 = vrot.lane.b32.xlu1 %v190_v2, %s1177_s17 }
  0x58   : > { %267 = vperm.xlu0 %1067, %v264_v4  }
  0xaa   : > { %v202_v6 = vpop.permute.xlu1 %201  ;;  %v196_v7 = vpop.permute.xlu0 %195 }
  0xab   : > { %v257_v11 = vsel %vm255_vm1, %v190_v2, %v196_v7 }
  0xac   : > { %v278_v19 = vand.u32 4294901760, %v257_v11 }
  0xae   : > { %v212_v8 = vpop.permute.xlu1 %211  ;;  %v194_v9 = vpop.permute.xlu0 %193  ;;  %v1342_v39 = vsub.f32 %v257_v11, %v278_v19 }
  0xaf   : > { %v198_v10 = vsel %vm197_vm0, %v194_v9, %v196_v7 }
  0xb0   : > { %v256_v12 = vsel %vm255_vm1, %v187_v0, %v198_v10  ;;  %v366_v48 = vand.u32 4294901760, %v1342_v39 }
  0xb1   : > { %v280_v22 = vand.u32 4294901760, %v256_v12 }
  0xb2   : > { %v210_v13 = vpop.permute.xlu0 %209  ;;  %v204_v14 = vpop.permute.xlu1 %203  ;;  %v367_v1 = vsub.f32 %v1342_v39, %v366_v48 }
  0xb3   : > { %v214_v16 = vsel %vm213_vm2, %v210_v13, %v212_v8  ;;  %v206_v17 = vsel %vm205_vm3, %v202_v6, %v204_v14  ;;  %v259_v18 = vsel %vm255_vm1, %v204_v14, %v212_v8  ;;  %v1344_v40 = vsub.f32 %v256_v12, %v280_v22 }
  0xb4   : > { %v258_v20 = vsel %vm255_vm1, %v206_v17, %v214_v16  ;;  %v282_v21 = vand.u32 4294901760, %v259_v18 }
  0xb5   : > { %v284_v23 = vand.u32 4294901760, %v258_v20  ;;  %v372_v49 = vand.u32 4294901760, %v1344_v40 }
  0xb6   : > { %v218_v25 = vpop.permute.xlu0 %217  ;;  %v220_v26 = vpop.permute.xlu1 %219  ;;  %v1325_v27 = vpack.c.bf16 %v282_v21, %v278_v19  ;;  %v1335_v30 = vsub.f32 %v259_v18, %v282_v21  ;;  %v368_v19 = vand.u32 4294901760, %v367_v1 }
  0xb7   : > { %v1327_v28 = vpack.c.bf16 %v284_v23, %v280_v22  ;;  %v222_v33 = vsel %vm221_vm5, %v218_v25, %v220_v26  ;;  %v1346_v41 = vsub.f32 %v258_v20, %v284_v23  ;;  %v373_v62 = vsub.f32 %v1344_v40, %v372_v49 }
  0xb8   : > { %952 = vmatprep.subr.bf16.mxu1 %v1325_v27  ;;  %976 = vmatprep.subr.bf16.mxu0 %v1325_v27  ;;  %v378_v42 = vand.u32 4294901760, %v1335_v30  ;;  %v357_v20 = vand.u32 4294901760, %v356_v61 }
  0xb9   : > { %954 = vmatpush1.bf16.msra.mxu1 %v1327_v28  ;;  %978 = vmatpush1.bf16.msra.mxu0 %v1327_v28  ;;  %v384_v50 = vand.u32 4294901760, %v1346_v41  ;;  %v374_v22 = vand.u32 4294901760, %v373_v62 }
  0xba   : > { %v226_v31 = vpop.permute.xlu0 %225  ;;  %v228_v32 = vpop.permute.xlu1 %227  ;;  %v379_v54 = vsub.f32 %v1335_v30, %v378_v42 }
  0xbb   : > { %v230_v34 = vsel %vm229_vm6, %v226_v31, %v228_v32  ;;  %v261_v35 = vsel %vm255_vm1, %v220_v26, %v228_v32  ;;  %v385_v63 = vsub.f32 %v1346_v41, %v384_v50  ;;  %v983_v32 = vpack.c.bf16 %v378_v42, %v366_v48 }
  0xbc   : > { %v260_v36 = vsel %vm255_vm1, %v222_v33, %v230_v34  ;;  %v286_v37 = vand.u32 4294901760, %v261_v35  ;;  %v380_v8 = vand.u32 4294901760, %v379_v54 }
  0xbd   : > { %v288_v43 = vand.u32 4294901760, %v260_v36  ;;  %v386_v23 = vand.u32 4294901760, %v385_v63 }
  0xbe   : > { %v234_v44 = vpop.permute.xlu0 %233  ;;  %v236_v45 = vpop.permute.xlu1 %235  ;;  %v1349_v46 = vsub.f32 %v261_v35, %v286_v37  ;;  %v959_v31 = vpack.c.bf16 %v380_v8, %v368_v19 }
  0xbf   : > { %v1355_v51 = vsub.f32 %v260_v36, %v288_v43  ;;  %v238_v55 = vsel %vm237_vm7, %v234_v44, %v236_v45  ;;  %v961_v44 = vpack.c.bf16 %v386_v23, %v374_v22 }
  0xc0   : > { %v390_v58 = vand.u32 4294901760, %v1349_v46 }
  0xc1   : > { %v396_v2 = vand.u32 4294901760, %v1355_v51 }
  0xc2   : > { %v242_v52 = vpop.permute.xlu0 %241  ;;  %v244_v53 = vpop.permute.xlu1 %243  ;;  %v391_v16 = vsub.f32 %v1349_v46, %v390_v58 }
  0xc3   : > { %v246_v56 = vsel %vm245_vm8, %v242_v52, %v244_v53  ;;  %v263_v57 = vsel %vm255_vm1, %v236_v45, %v244_v53  ;;  %v397_v33 = vsub.f32 %v1355_v51, %v396_v2 }
  0xc4   : > { %v262_v59 = vsel %vm255_vm1, %v238_v55, %v246_v56  ;;  %v290_v60 = vand.u32 4294901760, %v263_v57  ;;  %v392_v35 = vand.u32 4294901760, %v391_v16  ;;  %v967_v56 = vpack.c.bf16 %v1335_v30, %v1342_v39 }
  0xc5   : > { %v292_v0 = vand.u32 4294901760, %v262_v59  ;;  %v398_v53 = vand.u32 4294901760, %v397_v33 }
  0xc6   : > { %v1369_v4 = vsub.f32 %v263_v57, %v290_v60  ;;  %v250_v5 = vpop.permute.xlu0 %249  ;;  %v252_v6 = vpop.permute.xlu1 %251  ;;  %v1371_v7 = vpack.c.bf16 %v290_v60, %v286_v37  ;;  %v985_v37 = vpack.c.bf16 %v384_v50, %v372_v49  ;;  %v969_v57 = vpack.c.bf16 %v1346_v41, %v1344_v40 }
  0xc7   : > { %v1373_v9 = vsub.f32 %v262_v59, %v292_v0  ;;  %v254_v10 = vsel %vm253_vm9, %v250_v5, %v252_v6  ;;  %v276_v11 = vsel %vm255_vm1, %v252_v6, 0  ;;  %v1377_v12 = vpack.c.bf16 %v292_v0, %v288_v43 }
  0xc8   : > { %v402_v13 = vand.u32 4294901760, %v1369_v4  ;;  %v274_v14 = vsel %vm255_vm1, %v254_v10, 0  ;;  %v1381_v15 = vand.u32 4294901760, %v276_v11  ;;  %956 = vmatprep.subr.bf16.mxu1 %v1371_v7  ;;  %980 = vmatprep.subr.bf16.mxu0 %v1371_v7 }
  0xc9   : > { %v408_v17 = vand.u32 4294901760, %v1373_v9  ;;  %v1387_v18 = vand.u32 4294901760, %v274_v14  ;;  %958 = vmatpush1.bf16.msra.mxu1 %v1377_v12  ;;  %982 = vmatpush1.bf16.msra.mxu0 %v1377_v12 }
  0xca   : > { %v413_v21 = vsub.f32 %v276_v11, %v1381_v15  ;;  %295 = vmatprep.subr.mxu1 %v1381_v15  ;;  %596 = vmatprep.subr.mxu0 %v1381_v15  ;;  %v403_v24 = vsub.f32 %v1369_v4, %v402_v13  ;;  %v987_v42 = vpack.c.bf16 %v402_v13, %v390_v58 }
  0xcb   : > { %v409_v25 = vsub.f32 %v1373_v9, %v408_v17  ;;  %v419_v26 = vsub.f32 %v274_v14, %v1387_v18  ;;  %v989_v55 = vpack.c.bf16 %v408_v17, %v396_v2  ;;  %v971_v58 = vpack.c.bf16 %v1369_v4, %v1349_v46 }
  0xcc   : > { %v414_v34 = vand.u32 4294901760, %v413_v21  ;;  %v404_v36 = vand.u32 4294901760, %v403_v24 }
  0xcd   : > { %297 = vmatpush1.msra.mxu1 %v1387_v18  ;;  %598 = vmatpush1.msra.mxu0 %v1387_v18  ;;  %v420_v43 = vand.u32 4294901760, %v419_v26  ;;  %v410_v52 = vand.u32 4294901760, %v409_v25 }
  0xce   : > { %960 = vmatprep.subr.bf16.mxu1 %v959_v31  ;;  %984 = vmatprep.subr.bf16.mxu0 %v983_v32  ;;  %v963_v45 = vpack.c.bf16 %v404_v36, %v392_v35  ;;  %v415_v48 = vsub.f32 %v413_v21, %v414_v34 }
  0xcf   : > { %358 = vmatmul.mubr.f32.vlgmr.msra.gmra.mrb[0].mxu1 %v357_v20  ;;  %657 = vmatmul.mubr.f32.vlgmr.msra.gmra.mrb[0].mxu0 %v355_v47  ;;  %v965_v54 = vpack.c.bf16 %v410_v52, %v398_v53  ;;  %v421_v49 = vsub.f32 %v419_v26, %v420_v43 }
  0xd0   : > { %962 = vmatpush1.bf16.msra.mxu1 %v961_v44  ;;  %986 = vmatpush1.bf16.msra.mxu0 %v985_v37  ;;  %v416_v50 = vand.u32 4294901760, %v415_v48 }
  0xd1   : > { %964 = vmatprep.subr.bf16.mxu1 %v963_v45  ;;  %988 = vmatprep.subr.bf16.mxu0 %v987_v42  ;;  %v422_v47 = vand.u32 4294901760, %v421_v49 }
  0xd2   : > { %478 = vmatprep.mubr.f32.mxu1 %v1175_v3  ;;  %757 = vmatprep.mubr.f32.mxu0 %v1175_v3 }
  0xd4   : > { %966 = vmatpush1.bf16.msra.mxu1 %v965_v54  ;;  %990 = vmatpush1.bf16.msra.mxu0 %v989_v55 }
  0xd5   : > { %417 = vmatprep.subr.mxu1 %v416_v50  ;;  %698 = vmatprep.subr.mxu0 %v414_v34 }
  0xd8   : > { %423 = vmatpush1.msra.mxu1 %v422_v47  ;;  %702 = vmatpush1.msra.mxu0 %v420_v43 }
  0xd9   : > { %968 = vmatprep.subr.bf16.mxu1 %v967_v56  ;;  %992 = vmatprep.subr.bf16.mxu0 %v1325_v27  ;;  %v973_v27 = vpack.c.bf16 %v1373_v9, %v1355_v51 }
  0xda   : > { %480 = vmatmul.mubr.f32.vlgmr.msra.gmra.mrb[0].mxu1 %v1331_v29  ;;  %759 = vmatmul.mubr.f32.vlgmr.msra.gmra.mrb[0].mxu0 %v1331_v29 }
  0xdb   : > { %970 = vmatpush1.bf16.msra.mxu1 %v969_v57  ;;  %994 = vmatpush1.bf16.msra.mxu0 %v1327_v28  ;;  %v268_v28 = vpop.permute.xlu0 %267 }
  0xdc   : > { %972 = vmatprep.subr.bf16.mxu1 %v971_v58  ;;  %996 = vmatprep.subr.bf16.mxu0 %v1371_v7 }
  0xdd   : > { %570 = vmatprep.mubr.f32.mxu1 %v1175_v3  ;;  %839 = vmatprep.mubr.f32.mxu0 %v1175_v3 }
  0xdf   : > { %974 = vmatpush1.bf16.msra.mxu1 %v973_v27  ;;  %998 = vmatpush1.bf16.msra.mxu0 %v1377_v12 }
  0xe0   : > { %512 = vmatprep.subr.mxu1 %v413_v21  ;;  %782 = vmatprep.subr.mxu0 %v1381_v15 }
  0xe3   : > { %515 = vmatpush1.msra.mxu1 %v419_v26  ;;  %784 = vmatpush1.msra.mxu0 %v1387_v18 }
  0xe4   : > { %573 = vmatmul.mubr.f32.vlgmr.msra.gmra.mrb[0].mxu1 %v1340_v38  ;;  %841 = vmatmul.mubr.f32.vlgmr.msra.gmra.mrb[0].mxu0 %v1331_v29 }
 0x1b7   : > { %v574_v30 = vpop.f32.mrb[0].mxu1  ;;  %v842_v39 = vpop.f32.mrb[0].mxu0 }
 0x1b8   : > { %v999_v3 = vadd.f32 %v574_v30, %v268_v28  ;;  %v576_v40 = vpop.f32.mrb[1].mxu1  ;;  %v844_v41 = vpop.f32.mrb[1].mxu0 }
 0x1b9   : > { %v1001_v46 = vadd.f32 %v576_v40, %v268_v28 }
 0x1ba   : > { %v1000_v51 = vadd.f32 %v999_v3, %v842_v39 }
 0x1bb   : > { %v1002_v59 = vadd.f32 %v1001_v46, %v844_v41 }
 0x1bc   : > { %848 = vst [vmem:[%s186_s30] sm:$0xff] %v1000_v51 }
 0x1bd   : > { %v847_v29 = vsel %vm253_vm9, %v1002_v59, 0.0 }
 0x1be   : > { %849 = vst.msk [vmem:[%s186_s30 + $0x8] sm:$0xff] %vm237_vm7, %v847_v29 }
 0x1bf   : > { %1113 = shalt.err (!%p1110_p4)
}
 0x1c0   : > { %s1114_s29 = scalar_lea.hbm %s1429_s6, 256  ;;  %s1118_s19 = scalar_lea.hbm %s1478_s3, 512 }
 0x1c1   : > { %p1115_p5 = scmp.ne.s32.totalorder %s1429_s6, %s1114_s29  ;;  %p1119_p0 = scmp.lt.u32.totalorder %s1429_s6, %s1478_s3 }
 0x1c2   : > { %p1120_p1 = scmp.lt.u32.totalorder %s1118_s19, %s1114_s29  ;;  %p1122_p6 = scmp.lt.u32.totalorder %s1114_s29, %s1429_s6 }
 0x1c3   : > { %p1116_p8 = pnand %p1115_p5, %p1487_p11 }
 0x1c4   : > { %p1121_p3 = por %p1120_p1, %p1119_p0 }
 0x1c5   : > { %p1117_p9 = pneg %p1116_p8 }
 0x1c6   : > { %p1123_p12 = por %p1122_p6, %p1121_p3 }
 0x1c8   : > { %p1124_p13 = pnand %p1123_p12, %p1117_p9 }
 0x1ca   : > { %1127 = shalt.err (!%p1124_p13)
}
 0x1cb   : > { %1013 = dma.vmem_to_hbm [thread:$0]  (%p1487_p11), %s1431_s5, 256, %s1429_s6, %s851_s16  }
 0x1cc PF: > { %s877_s26 = sand.u32 1, %s1154_s12   ;;  %p1488_p7 = scmp.ne.s32.totalorder %s1483_s25, 0 }
 0x1cd   : > { %p1489_p10 = scmp.ge.s32.totalorder %s1166_s15, 2  ;;  %s878_s27 = scalar_lea.sflag [#allocation4], %s877_s26 }
 0x1cf   : > { %p1020_p2 = pnand %p1489_p10, %p1488_p7 }
 0x1d1   : > { %1149 = dma.done.wait (!%p1020_p2), %s878_s27, 256  }
 0x1d2   : > { %1151 = vsyncadd (!%p1020_p2), %s878_s27, 4294967040  ;;  %p16_p4 = scmp.ge.s32.totalorder %s1225_s18, 4   ;;  %s1490_s12 = smov %s1158_s13 }
 0x1d3   : > { %s1491_s13 = smov %s1162_s14  ;;  %s1492_s14 = smov %s1237_s21 }
 0x1d4   : > { %s1493_s15 = smov %s1225_s18  ;;  %18 = sbr.rel (!%p16_p4) target bundleno = 5 (0x5), region = 77 }
 0x1db   :  { %883 = vsyncpa [#allocation3], 1 }
 0x1dc   :  { %885 = vsyncpa [#allocation3 + $0x1], 1 }
 0x1dd   :  { %886 = vsyncpa [#allocation4], 1 }
 0x1de   :  { %888 = vsyncpa [#allocation4 + $0x1], 1 }

</bundles_post_ra>
